<compile_context>
chip_gen: v6e
topology: v6e:2x2x1
jax: 0.10.0
libtpu: 0.0.40
codegen_flags: <defaults>
</compile_context>

<pallas_src>
import copy

import jax
import jax.numpy as jnp
import numpy as np
from jax.experimental import pallas as pl
from jax.experimental.pallas import tpu as pltpu


def build_interactions():
    """Reproduce the index list from InteractionDecoder.__init__."""
    interactions = []
    for i in range(100):
        interactions.extend((200 - i, 200 + i, 200 - i - 1, 200 + i))
    interactions.extend((100, 300))
    interactions = interactions[2:]            # len == 400  -> 200 pairs
    interactions_flipped = copy.deepcopy(interactions)
    interactions_flipped.reverse()
    return interactions, interactions_flipped


def _round_up(x, m):
    return ((x + m - 1) // m) * m


def _interaction_decoder_kernel(xt_ref, gt_ref, w1tT_ref, w1bT_ref, b1c_ref,
                                w2T_ref, b2c_ref, o_ref):
    # xt_ref  : (Bt*C, S)   bf16   channel-major inputs for Bt batch elements
    # gt_ref  : (S, 2*Np)   bf16   merged one-hot gather matrix [Ga^T | Gb^T] (exact 0/1)
    # w1tT/w1bT : (C, C)    bf16   Linear(2C->C) weight halves, pre-transposed [out, in]
    # b1c     : (C, 1)      f32
    # w2T     : (Cout, C)   bf16   Linear(C->Cout) weight, pre-transposed [out, in]
    # b2c     : (Cout, 1)   f32
    # o_ref   : (Bt, Cout, Np) f32 transposed, lane-padded output
    Bt, Cout, Np = o_ref.shape
    C = w1tT_ref.shape[0]

    # Fused interaction gather for ALL Bt batch rows in ONE MXU pass (exact selection).
    xg = jnp.dot(xt_ref[...], gt_ref[...],
                 preferred_element_type=jnp.float32).astype(jnp.bfloat16)  # (Bt*C, 2*Np)

    w1tT = w1tT_ref[...]
    w1bT = w1bT_ref[...]
    w2T = w2T_ref[...]
    # Hoisted bias broadcasts (JAX does not CSE broadcast_in_dim across loop iterations).
    b1 = jnp.broadcast_to(b1c_ref[...], (C, Np))
    b2 = jnp.broadcast_to(b2c_ref[...], (Cout, Np))

    for b in range(Bt):                         # static unroll; Bt is small
        rows = slice(b * C, (b + 1) * C)        # C multiple of 8 -> sublane-aligned
        xa = xg[rows, :Np]                      # (C, Np) left members  (lane-aligned)
        xb = xg[rows, Np:]                      # (C, Np) right members (lane-aligned)

        # Linear(2C -> C) split into its two C-wide halves, f32 accumulation, then ReLU.
        h = (jnp.dot(w1tT, xa, preferred_element_type=jnp.float32)
             + jnp.dot(w1bT, xb, preferred_element_type=jnp.float32)
             + b1)
        h = jnp.maximum(h, 0.0).astype(jnp.bfloat16)

        # Linear(C -> Cout)
        o = jnp.dot(w2T, h, preferred_element_type=jnp.float32) + b2
        o_ref[b] = o.astype(o_ref.dtype)        # full-width (Cout, Np) lane-dense store


def interaction_decoder_pallas(xt, gt, w1tT, w1bT, b1c, w2T, b2c, *, batch, bt):
    """xt: (B*C, S) bf16; gt: (S, 2*Np) bf16; returns (B, Cout, Np) f32 (transposed)."""
    BC, S = xt.shape
    C = w1tT.shape[0]
    Cout = w2T.shape[0]
    Np = gt.shape[1] // 2
    assert BC == batch * C and batch % bt == 0

    # Advisory cost estimate so XLA schedules this tiny call tightly.
    flops = int(2 * batch * C * S * 2 * Np                 # merged gather
                + 2 * batch * (2 * C * C + Cout * C) * Np)  # both linears
    bytes_accessed = int(xt.size * 2 + gt.size * 2
                         + (w1tT.size + w1bT.size + w2T.size) * 2
                         + (b1c.size + b2c.size) * 4
                         + batch * Cout * Np * 4)

    grid_spec = pl.GridSpec(
        grid=(batch // bt,),
        in_specs=[
            pl.BlockSpec((bt * C, S), lambda i: (i, 0)),      # per-step batch-tile of x^T
            pl.BlockSpec((S, 2 * Np), lambda i: (0, 0)),      # merged one-hot (resident)
            pl.BlockSpec((C, C), lambda i: (0, 0)),           # W1 top half^T  (resident)
            pl.BlockSpec((C, C), lambda i: (0, 0)),           # W1 bottom half^T
            pl.BlockSpec((C, 1), lambda i: (0, 0)),           # b1 (column)
            pl.BlockSpec((Cout, C), lambda i: (0, 0)),        # W2^T
            pl.BlockSpec((Cout, 1), lambda i: (0, 0)),        # b2 (column)
        ],
        out_specs=pl.BlockSpec((bt, Cout, Np), lambda i: (i, 0, 0)),
    )
    return pl.pallas_call(
        _interaction_decoder_kernel,
        out_shape=jax.ShapeDtypeStruct((batch, Cout, Np), jnp.float32),
        grid_spec=grid_spec,
        # parallel vs arbitrary measured ~neutral; at small B there is a single grid step
        # anyway, so no 2-TC split is attempted (per review, it would not pay here).
        compiler_params=pltpu.CompilerParams(dimension_semantics=("arbitrary",)),
        cost_estimate=pl.CostEstimate(flops=flops, transcendentals=0,
                                      bytes_accessed=bytes_accessed),
    )(xt, gt, w1tT, w1bT, b1c, w2T, b2c)


class InteractionDecoderPallas:
    """JAX/Pallas port of InteractionDecoder (eval path, no flip augmentation)."""

    def __init__(self, channels_in, channels_out, var_flg=False, key=None):
        if var_flg:
            channels_out = 2
        self.channels_in = channels_in
        self.channels_out = channels_out

        self.interactions, self.interactions_flipped = build_interactions()
        # TODO(synk): training-time flip_augmentation branch (random flip) not implemented;
        # it is a stochastic training-only path, eval semantics are exact.
        pairs = np.asarray(self.interactions, dtype=np.int32).reshape(-1, 2)
        self.left_idx = pairs[:, 0]
        self.right_idx = pairs[:, 1]
        self.n_inter = int(pairs.shape[0])                 # 200
        self.n_pad = _round_up(self.n_inter, 128)          # 256 (lane-aligned)
        self.max_index = int(pairs.max())                  # 300

        # Deterministic parameter init (shapes of nn.Linear(2C, C) / nn.Linear(C, C_out)),
        # stored [in, out]. bf16 pre-transposed copies feed the MXU; biases stay f32.
        if key is None:
            key = jax.random.PRNGKey(0)
        k1, k2, k3, k4 = jax.random.split(key, 4)
        C = channels_in
        c2 = 2 * C
        s1 = 1.0 / jnp.sqrt(c2)
        s2 = 1.0 / jnp.sqrt(C)
        self.w1 = jax.random.uniform(k1, (c2, C), jnp.float32, -s1, s1)
        self.b1 = jax.random.uniform(k2, (1, C), jnp.float32, -s1, s1)
        self.w2 = jax.random.uniform(k3, (C, channels_out), jnp.float32, -s2, s2)
        self.b2 = jax.random.uniform(k4, (1, channels_out), jnp.float32, -s2, s2)

        self.w1tT_bf = self.w1[:C].T.astype(jnp.bfloat16)      # (C, C)   [out, in_left]
        self.w1bT_bf = self.w1[C:].T.astype(jnp.bfloat16)      # (C, C)   [out, in_right]
        self.w2T_bf = self.w2.T.astype(jnp.bfloat16)           # (Cout, C)
        self.b1_col = self.b1.reshape(C, 1)                    # (C, 1)
        self.b2_col = self.b2.reshape(channels_out, 1)         # (Cout, 1)

        self._gt_cache = {}

    def _gather_matrix(self, seq_len):
        """Merged, transposed one-hot gather matrix G^T: (S, 2*Np).
        Columns [0,N) select the LEFT pair member, [Np,Np+N) the RIGHT; pads are zero."""
        if seq_len not in self._gt_cache:
            gt = np.zeros((seq_len, 2 * self.n_pad), dtype=np.float32)
            gt[self.left_idx, np.arange(self.n_inter)] = 1.0
            gt[self.right_idx, self.n_pad + np.arange(self.n_inter)] = 1.0
            self._gt_cache[seq_len] = jnp.asarray(gt, dtype=jnp.bfloat16)
        return self._gt_cache[seq_len]

    def __call__(self, x):
        # x: [batch, seq, channels_in]; seq must cover indices 100..300.
        B, S, C = x.shape
        assert C == self.channels_in
        assert S > self.max_index
        gt = self._gather_matrix(S)

        # Channel-major bf16 input: halves input DMA and puts the interaction axis on the
        # MXU output-column / lane dimension inside the kernel.
        xt = jnp.swapaxes(x, 1, 2).astype(jnp.bfloat16).reshape(B * C, S)

        bt = B if B <= 8 else 8                 # VMEM is not the constraint; cap unroll
        assert B % bt == 0, "batch must be a multiple of the batch tile"
        out_t = interaction_decoder_pallas(
            xt, gt, self.w1tT_bf, self.w1bT_bf, self.b1_col,
            self.w2T_bf, self.b2_col, batch=B, bt=bt)          # (B, Cout, Np)

        out = jnp.swapaxes(out_t[:, :, :self.n_inter], 1, 2)   # (B, N, Cout), tiny XLA op
        # Mimic torch .squeeze() (squeezes ALL unit dims, e.g. B==1 or Cout==1).
        return jnp.squeeze(out)

    def reference(self, x):
        """Pure-JAX reference mirroring the kernel's bf16-input / f32-accum semantics."""
        B, S, C = x.shape
        xb = x.astype(jnp.bfloat16).astype(jnp.float32)
        idx = jnp.asarray(self.interactions, dtype=jnp.int32)
        xg = xb[:, idx, :]                                     # [B, 400, C]
        xp = xg.reshape(B, self.n_inter, 2 * C)                # [B, 200, 2C]
        w1 = self.w1.astype(jnp.bfloat16).astype(jnp.float32)
        h = jnp.maximum(xp @ w1 + self.b1, 0.0)
        h = h.astype(jnp.bfloat16).astype(jnp.float32)
        o = h @ self.w2.astype(jnp.bfloat16).astype(jnp.float32) + self.b2
        return jnp.squeeze(o)


if __name__ == "__main__":
    key = jax.random.PRNGKey(0)
    kx, kp = jax.random.split(key)

    batch = 2
    channels_in = 32
    channels_out = 8
    seq = 301                      # indices used by the module span [100, 300]

    x = jax.random.normal(kx, (batch, seq, channels_in), dtype=jnp.float32)

    dec = InteractionDecoderPallas(channels_in, channels_out, var_flg=False, key=kp)

    out = jax.block_until_ready(dec(x))
    ref = dec.reference(x)

    assert out.shape == (batch, dec.n_inter, channels_out), out.shape
    assert jnp.allclose(out, ref, atol=1e-4, rtol=1e-4), "mismatch vs pure-JAX reference"

    print("KERNEL_OK")
</pallas_src>

<mosaic_0001>
module attributes {stable_mosaic.version = 11 : i64} {
  func.func @_interaction_decoder_kernel(%arg0: i32, %arg1: memref<64x301xbf16, #tpu.memory_space<vmem>>, %arg2: memref<301x512xbf16, #tpu.memory_space<vmem>>, %arg3: memref<32x32xbf16, #tpu.memory_space<vmem>>, %arg4: memref<32x32xbf16, #tpu.memory_space<vmem>>, %arg5: memref<32x1xf32, #tpu.memory_space<vmem>>, %arg6: memref<8x32xbf16, #tpu.memory_space<vmem>>, %arg7: memref<8x1xf32, #tpu.memory_space<vmem>>, %arg8: memref<2x8x256xf32, #tpu.memory_space<vmem>>) attributes {dimension_semantics = [#tpu.dimension_semantics<arbitrary>], iteration_bounds = array<i64: 1>, scalar_prefetch = 0 : i64, scratch_operands = 0 : i64, tpu.core_type = #tpu.core_type<tc>, window_params = [{transform_indices = @transform_0, window_bounds = array<i64: 64, 301>}, {pipeline_mode = #tpu.pipeline_mode<synchronous>, transform_indices = @transform_1, window_bounds = array<i64: 301, 512>}, {pipeline_mode = #tpu.pipeline_mode<synchronous>, transform_indices = @transform_2, window_bounds = array<i64: 32, 32>}, {pipeline_mode = #tpu.pipeline_mode<synchronous>, transform_indices = @transform_3, window_bounds = array<i64: 32, 32>}, {pipeline_mode = #tpu.pipeline_mode<synchronous>, transform_indices = @transform_4, window_bounds = array<i64: 32, 1>}, {pipeline_mode = #tpu.pipeline_mode<synchronous>, transform_indices = @transform_5, window_bounds = array<i64: 8, 32>}, {pipeline_mode = #tpu.pipeline_mode<synchronous>, transform_indices = @transform_6, window_bounds = array<i64: 8, 1>}, {transform_indices = @transform_7, window_bounds = array<i64: 2, 8, 256>}]} {
    %c0 = arith.constant 0 : index
    %c0_0 = arith.constant 0 : index
    %0 = vector.load %arg1[%c0, %c0_0] : memref<64x301xbf16, #tpu.memory_space<vmem>>, vector<64x301xbf16>
    %c0_1 = arith.constant 0 : index
    %c0_2 = arith.constant 0 : index
    %1 = vector.load %arg2[%c0_1, %c0_2] : memref<301x512xbf16, #tpu.memory_space<vmem>>, vector<301x512xbf16>
    %cst = arith.constant dense<0.000000e+00> : vector<64x512xf32>
    %2 = tpu.matmul %0, %1, %cst {dimension_numbers = #tpu.dot_dimension_numbers<[1], [0], [0], [1], [0, 0, 1, 1], [], []>} : vector<64x301xbf16>, vector<301x512xbf16>, vector<64x512xf32> -> vector<64x512xf32>
    %3 = arith.truncf %2 : vector<64x512xf32> to vector<64x512xbf16>
    %c0_3 = arith.constant 0 : index
    %c0_4 = arith.constant 0 : index
    %4 = vector.load %arg3[%c0_3, %c0_4] : memref<32x32xbf16, #tpu.memory_space<vmem>>, vector<32x32xbf16>
    %c0_5 = arith.constant 0 : index
    %c0_6 = arith.constant 0 : index
    %5 = vector.load %arg4[%c0_5, %c0_6] : memref<32x32xbf16, #tpu.memory_space<vmem>>, vector<32x32xbf16>
    %c0_7 = arith.constant 0 : index
    %c0_8 = arith.constant 0 : index
    %6 = vector.load %arg6[%c0_7, %c0_8] : memref<8x32xbf16, #tpu.memory_space<vmem>>, vector<8x32xbf16>
    %c0_9 = arith.constant 0 : index
    %c0_10 = arith.constant 0 : index
    %7 = vector.load %arg5[%c0_9, %c0_10] : memref<32x1xf32, #tpu.memory_space<vmem>>, vector<32x1xf32>
    %8 = vector.shape_cast %7 : vector<32x1xf32> to vector<32x1xf32>
    %9 = vector.broadcast %8 : vector<32x1xf32> to vector<32x256xf32>
    %c0_11 = arith.constant 0 : index
    %c0_12 = arith.constant 0 : index
    %10 = vector.load %arg7[%c0_11, %c0_12] : memref<8x1xf32, #tpu.memory_space<vmem>>, vector<8x1xf32>
    %11 = vector.shape_cast %10 : vector<8x1xf32> to vector<8x1xf32>
    %12 = vector.broadcast %11 : vector<8x1xf32> to vector<8x256xf32>
    %13 = vector.extract_strided_slice %3 {offsets = [0, 0], sizes = [32, 256], strides = [1, 1]} : vector<64x512xbf16> to vector<32x256xbf16>
    %14 = vector.extract_strided_slice %3 {offsets = [0, 256], sizes = [32, 256], strides = [1, 1]} : vector<64x512xbf16> to vector<32x256xbf16>
    %cst_13 = arith.constant dense<0.000000e+00> : vector<32x256xf32>
    %15 = tpu.matmul %4, %13, %cst_13 {dimension_numbers = #tpu.dot_dimension_numbers<[1], [0], [0], [1], [0, 0, 1, 1], [], []>} : vector<32x32xbf16>, vector<32x256xbf16>, vector<32x256xf32> -> vector<32x256xf32>
    %cst_14 = arith.constant dense<0.000000e+00> : vector<32x256xf32>
    %16 = tpu.matmul %5, %14, %cst_14 {dimension_numbers = #tpu.dot_dimension_numbers<[1], [0], [0], [1], [0, 0, 1, 1], [], []>} : vector<32x32xbf16>, vector<32x256xbf16>, vector<32x256xf32> -> vector<32x256xf32>
    %17 = arith.addf %15, %16 : vector<32x256xf32>
    %18 = arith.addf %17, %9 : vector<32x256xf32>
    %cst_15 = arith.constant 0.000000e+00 : f32
    %19 = vector.broadcast %cst_15 : f32 to vector<32x256xf32>
    %20 = arith.maximumf %18, %19 : vector<32x256xf32>
    %21 = arith.truncf %20 : vector<32x256xf32> to vector<32x256xbf16>
    %cst_16 = arith.constant dense<0.000000e+00> : vector<8x256xf32>
    %22 = tpu.matmul %6, %21, %cst_16 {dimension_numbers = #tpu.dot_dimension_numbers<[1], [0], [0], [1], [0, 0, 1, 1], [], []>} : vector<8x32xbf16>, vector<32x256xbf16>, vector<8x256xf32> -> vector<8x256xf32>
    %23 = arith.addf %22, %12 : vector<8x256xf32>
    %c0_17 = arith.constant 0 : index
    %c0_18 = arith.constant 0 : index
    %c0_19 = arith.constant 0 : index
    %24 = vector.load %arg8[%c0_17, %c0_18, %c0_19] : memref<2x8x256xf32, #tpu.memory_space<vmem>>, vector<1x8x256xf32>
    %25 = vector.shape_cast %24 : vector<1x8x256xf32> to vector<8x256xf32>
    %26 = vector.shape_cast %23 : vector<8x256xf32> to vector<1x8x256xf32>
    tpu.vector_store %arg8[%c0_17, %c0_18, %c0_19], %26 {strides = array<i32>} : memref<2x8x256xf32, #tpu.memory_space<vmem>>, vector<1x8x256xf32>,
    %27 = vector.extract_strided_slice %3 {offsets = [32, 0], sizes = [32, 256], strides = [1, 1]} : vector<64x512xbf16> to vector<32x256xbf16>
    %28 = vector.extract_strided_slice %3 {offsets = [32, 256], sizes = [32, 256], strides = [1, 1]} : vector<64x512xbf16> to vector<32x256xbf16>
    %cst_20 = arith.constant dense<0.000000e+00> : vector<32x256xf32>
    %29 = tpu.matmul %4, %27, %cst_20 {dimension_numbers = #tpu.dot_dimension_numbers<[1], [0], [0], [1], [0, 0, 1, 1], [], []>} : vector<32x32xbf16>, vector<32x256xbf16>, vector<32x256xf32> -> vector<32x256xf32>
    %cst_21 = arith.constant dense<0.000000e+00> : vector<32x256xf32>
    %30 = tpu.matmul %5, %28, %cst_21 {dimension_numbers = #tpu.dot_dimension_numbers<[1], [0], [0], [1], [0, 0, 1, 1], [], []>} : vector<32x32xbf16>, vector<32x256xbf16>, vector<32x256xf32> -> vector<32x256xf32>
    %31 = arith.addf %29, %30 : vector<32x256xf32>
    %32 = arith.addf %31, %9 : vector<32x256xf32>
    %cst_22 = arith.constant 0.000000e+00 : f32
    %33 = vector.broadcast %cst_22 : f32 to vector<32x256xf32>
    %34 = arith.maximumf %32, %33 : vector<32x256xf32>
    %35 = arith.truncf %34 : vector<32x256xf32> to vector<32x256xbf16>
    %cst_23 = arith.constant dense<0.000000e+00> : vector<8x256xf32>
    %36 = tpu.matmul %6, %35, %cst_23 {dimension_numbers = #tpu.dot_dimension_numbers<[1], [0], [0], [1], [0, 0, 1, 1], [], []>} : vector<8x32xbf16>, vector<32x256xbf16>, vector<8x256xf32> -> vector<8x256xf32>
    %37 = arith.addf %36, %12 : vector<8x256xf32>
    %c1 = arith.constant 1 : index
    %c0_24 = arith.constant 0 : index
    %c0_25 = arith.constant 0 : index
    %38 = vector.load %arg8[%c1, %c0_24, %c0_25] : memref<2x8x256xf32, #tpu.memory_space<vmem>>, vector<1x8x256xf32>
    %39 = vector.shape_cast %38 : vector<1x8x256xf32> to vector<8x256xf32>
    %40 = vector.shape_cast %37 : vector<8x256xf32> to vector<1x8x256xf32>
    tpu.vector_store %arg8[%c1, %c0_24, %c0_25], %40 {strides = array<i32>} : memref<2x8x256xf32, #tpu.memory_space<vmem>>, vector<1x8x256xf32>,
    return
  }
  func.func @transform_0(%arg0: i32) -> (i32, i32) {
    %c0_i32 = arith.constant 0 : i32
    %c0_i32_0 = arith.constant 0 : i32
    return %arg0, %c0_i32 : i32, i32
  }
  func.func @transform_1(%arg0: i32) -> (i32, i32) {
    %c0_i32 = arith.constant 0 : i32
    %c0_i32_0 = arith.constant 0 : i32
    %c0_i32_1 = arith.constant 0 : i32
    return %c0_i32, %c0_i32_0 : i32, i32
  }
  func.func @transform_2(%arg0: i32) -> (i32, i32) {
    %c0_i32 = arith.constant 0 : i32
    %c0_i32_0 = arith.constant 0 : i32
    %c0_i32_1 = arith.constant 0 : i32
    return %c0_i32, %c0_i32_0 : i32, i32
  }
  func.func @transform_3(%arg0: i32) -> (i32, i32) {
    %c0_i32 = arith.constant 0 : i32
    %c0_i32_0 = arith.constant 0 : i32
    %c0_i32_1 = arith.constant 0 : i32
    return %c0_i32, %c0_i32_0 : i32, i32
  }
  func.func @transform_4(%arg0: i32) -> (i32, i32) {
    %c0_i32 = arith.constant 0 : i32
    %c0_i32_0 = arith.constant 0 : i32
    %c0_i32_1 = arith.constant 0 : i32
    return %c0_i32, %c0_i32_0 : i32, i32
  }
  func.func @transform_5(%arg0: i32) -> (i32, i32) {
    %c0_i32 = arith.constant 0 : i32
    %c0_i32_0 = arith.constant 0 : i32
    %c0_i32_1 = arith.constant 0 : i32
    return %c0_i32, %c0_i32_0 : i32, i32
  }
  func.func @transform_6(%arg0: i32) -> (i32, i32) {
    %c0_i32 = arith.constant 0 : i32
    %c0_i32_0 = arith.constant 0 : i32
    %c0_i32_1 = arith.constant 0 : i32
    return %c0_i32, %c0_i32_0 : i32, i32
  }
  func.func @transform_7(%arg0: i32) -> (i32, i32, i32) {
    %c0_i32 = arith.constant 0 : i32
    %c0_i32_0 = arith.constant 0 : i32
    %c0_i32_1 = arith.constant 0 : i32
    return %arg0, %c0_i32, %c0_i32_0 : i32, i32, i32
  }
}

</mosaic_0001>

<bundles_post_ra>
// kernel: tpu_custom_call.1
= control target key start
LH: loop header
LB: loop body
LE: loop exit
PB: predicated region body
PF: predicated region fallthrough
CT: control target
= control target key end

     0   :  { %12 = vsyncpa [#allocation3], 0  ;;  %s1939_s0 = inlined_call_operand.hbm [shape: bf16[64,301], index: 0, kind: input, shape index: {}]   ;;  %s1940_s1 = inlined_call_operand.hbm [shape: bf16[301,512], index: 1, kind: input, shape index: {}]   ;;  %s1941_s2 = inlined_call_operand.vmem [shape: bf16[32,32], index: 2, kind: input, shape index: {}]   ;;  %s1942_s3 = inlined_call_operand.vmem [shape: bf16[32,32], index: 3, kind: input, shape index: {}]   ;;  %s1943_s4 = inlined_call_operand.vmem [shape: f32[32,1], index: 4, kind: input, shape index: {}]   ;;  %s1944_s5 = inlined_call_operand.vmem [shape: bf16[8,32], index: 5, kind: input, shape index: {}]   ;;  %s1945_s6 = inlined_call_operand.vmem [shape: f32[8,1], index: 6, kind: input, shape index: {}]   ;;  %s1946_s7 = inlined_call_operand.hbm [shape: f32[2,8,256], index: 7, kind: output, shape index: {}]  }
   0x1   :  { %13 = vsyncpa [#allocation6], 0 }
   0x2   :  { %14 = vsyncpa [#allocation4], 0  ;;  %s1674_s24 = smov [#allocation2]  }
   0x3   :  { %s20_s25 = sshll.u32 %s1674_s24, 4  ;;  %s21_s25 = int_to_ptr.vmem [resolvable:$true] %s20_s25 }
   0x4   :  { %s1616_s26 = scalar_lea.vmem %s21_s25, 1536  ;;  %p1621_p1 = scmp.lt.s32.totalorder %s21_s25, %s21_s25 }
   0x5   :  { %p1617_p0 = scmp.ne.s32.totalorder %s21_s25, %s1616_s26  ;;  %p1622_p2 = scmp.lt.s32.totalorder %s1616_s26, %s1616_s26 }
   0x7   :  { %p1623_p3 = por %p1622_p2, %p1621_p1 }
   0x9   :  { %p1624_p4 = pnand %p1623_p3, %p1617_p0 }
   0xb   :  { %1627 = shalt.err (!%p1624_p4)
}
   0xc   :  { %s1675_s27 = smov 192   ;;  %s1676_s28 = smov 12  }
   0xd   :  { %26 = dma.hbm_to_vmem [thread:$0]  %s1939_s0, 1536, %s21_s25, [#allocation3], %s1675_s27, %s1675_s27, %s1676_s28  }
   0xe   :  { %s1677_s8 = smov [#allocation5]  }
   0xf   :  { %s32_s9 = sshll.u32 %s1677_s8, 4  ;;  %s33_s9 = int_to_ptr.vmem [resolvable:$true] %s32_s9 }
  0x10   :  { %s1636_s10 = scalar_lea.vmem %s33_s9, 9728  ;;  %p1641_p6 = scmp.lt.s32.totalorder %s33_s9, %s33_s9 }
  0x11   :  { %p1637_p5 = scmp.ne.s32.totalorder %s33_s9, %s1636_s10  ;;  %p1642_p7 = scmp.lt.s32.totalorder %s1636_s10, %s1636_s10 }
  0x13   :  { %p1643_p8 = por %p1642_p7, %p1641_p6 }
  0x15   :  { %p1644_p9 = pnand %p1643_p8, %p1637_p5 }
  0x17   :  { %1647 = shalt.err (!%p1644_p9)
}
  0x18   :  { %s1678_s11 = smov 256   ;;  %s1679_s12 = smov 16  }
  0x19   :  { %38 = dma.hbm_to_vmem [thread:$0]  %s1940_s1, 9728, %s33_s9, [#allocation6], %s1678_s11, %s1678_s11, %s1679_s12  }
  0x1a   :  { %1668 = dma.done.wait [#allocation3], 1536  }
  0x1b   :  { %1669 = vsyncadd [#allocation3], 4294965760 }
  0x1c   :  { %1670 = dma.done.wait [#allocation6], 9728  }
  0x1d   :  { %1671 = vsyncadd [#allocation6], 4294957568  ;;  %v1680_v0 = vmov 0   ;;  %vm597_vm0 = vcmask 1045504   ;;  %v1474_v1 = vld [vmem:[#allocation5 + $0xe4] ss:$16 sps:$4 sm:$0xff]  }
  0x1e   :  { %718 = vmatprep.mubr.bf16.mxu1 %v1680_v0  ;;  %1473 = vset.pattern.permute.xlu1 %v1680_v0  ;;  %v1476_v2 = vld [vmem:[#allocation5 + $0xe0] ss:$16 sps:$4 sm:$0xff]   ;;  %v1477_v3 = vld [vmem:[#allocation5 + $0xc4] ss:$16 sps:$4 sm:$0xff]   ;;  %vm598_vm1 = vcmask 1046528   ;;  %v1681_v4 = vmov 65535  }
  0x1f   :  { %1472 = vset.pattern.permute.xlu0 %v1680_v0  ;;  %613 = vmatprep.subr.bf16.mxu0 %v1474_v1  ;;  %v599_v5 = vsel %vm597_vm0, 4294967295, %v1681_v4  ;;  %v1479_v6 = vld [vmem:[#allocation5 + $0xc0] ss:$16 sps:$4 sm:$0xff]   ;;  %v1480_v7 = vld [vmem:[#allocation5 + $0xa4] ss:$16 sps:$4 sm:$0xff]   ;;  %vm584_vm2 = vcmask 367616  }
  0x20   :  { %614 = vmatpush1.bf16.msra.mxu0 %v1476_v2  ;;  %v1735_v8 = vsel %vm598_vm1, %v599_v5, 0  ;;  %v1486_v9 = vld [vmem:[#allocation5 + $0x244] ss:$16 sps:$4 sm:$0x7f]   ;;  %v1482_v11 = vld [vmem:[#allocation5 + $0xa0] ss:$16 sps:$4 sm:$0xff]  }
  0x21   :  { %615 = vmatprep.subr.bf16.mxu0 %v1477_v3  ;;  %v1488_v10 = vld [vmem:[#allocation5 + $0x240] ss:$16 sps:$4 sm:$0x7f]   ;;  %v1483_v12 = vld [vmem:[#allocation5 + $0x84] ss:$16 sps:$4 sm:$0xff]   ;;  %v605_v13 = vand.u32 %v1486_v9, %v1735_v8  ;;  %vm970_vm3 = vcmask 261120  }
  0x22   :  { %v602_v14 = vand.u32 %v1488_v10, %v1735_v8  ;;  %v1492_v15 = vld [vmem:[#allocation5 + $0x224] ss:$16 sps:$4 sm:$0xff]   ;;  %v1485_v16 = vld [vmem:[#allocation5 + $0x80] ss:$16 sps:$4 sm:$0xff]   ;;  %v1506_v23 = vld [vmem:[#allocation5 + $0xec] ss:$16 sps:$4 sm:$0xff]  }
  0x23   :  { %696 = vmatprep.subr.bf16.mxu1 %v605_v13  ;;  %v1489_v17 = vld [vmem:[#allocation5 + $0x64] ss:$16 sps:$4 sm:$0xff]   ;;  %v1494_v18 = vld [vmem:[#allocation5 + $0x220] ss:$16 sps:$4 sm:$0xff]   ;;  %v1504_v27 = vld [vmem:[#allocation5 + $0xe8] ss:$16 sps:$4 sm:$0xff]  }
  0x24   :  { %616 = vmatpush1.bf16.msra.mxu0 %v1479_v6  ;;  %697 = vmatpush1.bf16.msra.mxu1 %v602_v14  ;;  %v1498_v19 = vld [vmem:[#allocation5 + $0x204] ss:$16 sps:$4 sm:$0xff]   ;;  %v1491_v20 = vld [vmem:[#allocation5 + $0x60] ss:$16 sps:$4 sm:$0xff]   ;;  %v1513_v28 = vld [vmem:[#allocation5 + $0xcc] ss:$16 sps:$4 sm:$0xff]  }
  0x25   :  { %617 = vmatprep.subr.bf16.mxu0 %v1480_v7  ;;  %698 = vmatprep.subr.bf16.mxu1 %v1492_v15  ;;  %v1495_v21 = vld [vmem:[#allocation5 + $0x44] ss:$16 sps:$4 sm:$0xff]   ;;  %v1500_v22 = vld [vmem:[#allocation5 + $0x200] ss:$16 sps:$4 sm:$0xff]   ;;  %v1511_v31 = vld [vmem:[#allocation5 + $0xc8] ss:$16 sps:$4 sm:$0xff]  }
  0x26   :  { %v1497_v24 = vld [vmem:[#allocation5 + $0x40] ss:$16 sps:$4 sm:$0xff]   ;;  %v1739_v25 = vld [vmem:[#allocation2 + $0x8] ss:$12 sps:$4 sm:$0xff]   ;;  %v1519_v32 = vld [vmem:[#allocation5 + $0xac] ss:$16 sps:$4 sm:$0xff]  }
  0x27   :  { %v1501_v26 = vld [vmem:[#allocation5 + $0x24] ss:$16 sps:$4 sm:$0xff]   ;;  %v1503_v29 = vld [vmem:[#allocation5 + $0x20] ss:$16 sps:$4 sm:$0xff]   ;;  %v1517_v35 = vld [vmem:[#allocation5 + $0xa8] ss:$16 sps:$4 sm:$0xff]  }
  0x28   :  { %618 = vmatpush1.bf16.msra.mxu0 %v1482_v11  ;;  %699 = vmatpush1.bf16.msra.mxu1 %v1494_v18  ;;  %v1508_v30 = vld [vmem:[#allocation5 + $0x4] ss:$16 sps:$4 sm:$0xff]   ;;  %v1510_v33 = vld [vmem:[#allocation5] ss:$16 sps:$4 sm:$0xff]   ;;  %v1525_v36 = vld [vmem:[#allocation5 + $0x8c] ss:$16 sps:$4 sm:$0xff]  }
  0x29   :  { %619 = vmatprep.subr.bf16.mxu0 %v1483_v12  ;;  %700 = vmatprep.subr.bf16.mxu1 %v1498_v19  ;;  %v1514_v34 = vld [vmem:[#allocation5 + $0x1e4] ss:$16 sps:$4 sm:$0xff]   ;;  %v1516_v37 = vld [vmem:[#allocation5 + $0x1e0] ss:$16 sps:$4 sm:$0xff]   ;;  %v1523_v39 = vld [vmem:[#allocation5 + $0x88] ss:$16 sps:$4 sm:$0xff]  }
  0x2a   :  { %v1520_v38 = vld [vmem:[#allocation5 + $0x1c4] ss:$16 sps:$4 sm:$0xff]   ;;  %v1531_v40 = vld [vmem:[#allocation5 + $0x6c] ss:$16 sps:$4 sm:$0xff]   ;;  %v1522_v41 = vld [vmem:[#allocation5 + $0x1c0] ss:$16 sps:$4 sm:$0xff]  }
  0x2b   :  { %v1526_v42 = vld [vmem:[#allocation5 + $0x1a4] ss:$16 sps:$4 sm:$0xff]   ;;  %v1529_v43 = vld [vmem:[#allocation5 + $0x68] ss:$16 sps:$4 sm:$0xff]   ;;  %v1537_v44 = vld [vmem:[#allocation5 + $0x4c] ss:$16 sps:$4 sm:$0xff]  }
  0x2c   :  { %620 = vmatpush1.bf16.msra.mxu0 %v1485_v16  ;;  %701 = vmatpush1.bf16.msra.mxu1 %v1500_v22  ;;  %v1528_v45 = vld [vmem:[#allocation5 + $0x1a0] ss:$16 sps:$4 sm:$0xff]   ;;  %v1532_v46 = vld [vmem:[#allocation5 + $0x184] ss:$16 sps:$4 sm:$0xff]   ;;  %v1535_v47 = vld [vmem:[#allocation5 + $0x48] ss:$16 sps:$4 sm:$0xff]  }
  0x2d   :  { %621 = vmatprep.subr.bf16.mxu0 %v1489_v17  ;;  %759 = vmatprep.subr.bf16.mxu1 %v1506_v23  ;;  %v1543_v48 = vld [vmem:[#allocation5 + $0x2c] ss:$16 sps:$4 sm:$0xff]   ;;  %v1564_v49 = vld [vmem:[#allocation2 + $0x4] ss:$12 sps:$4 sm:$0xff]   ;;  %v1541_v52 = vld [vmem:[#allocation5 + $0x28] ss:$16 sps:$4 sm:$0xff]  }
  0x2e   :  { %v1744_v50 = vld [vmem:[#allocation2 + $0x20] ss:$12 sps:$4 sm:$0xff]   ;;  %v1538_v53 = vld [vmem:[#allocation5 + $0x164] ss:$16 sps:$4 sm:$0xff]   ;;  %645 = vmatprep.mubr.bf16.mxu0 %v1564_v49  ;;  %v1547_v56 = vld [vmem:[#allocation5 + $0x8] ss:$16 sps:$4 sm:$0xff]  }
  0x2f   :  { %1441 = vmatmul.mubr.msk.bf16.vlgmr.msra.gmra.mxu1 %vm584_vm2, %v1739_v25  ;;  %v1534_v51 = vld [vmem:[#allocation5 + $0x180] ss:$16 sps:$4 sm:$0xff]   ;;  %v1549_v54 = vld [vmem:[#allocation5 + $0xc] ss:$16 sps:$4 sm:$0xff]   ;;  %v1544_v57 = vld [vmem:[#allocation5 + $0x144] ss:$16 sps:$4 sm:$0xff]  }
  0x30   :  { %622 = vmatpush1.bf16.msra.mxu0 %v1491_v20  ;;  %760 = vmatpush1.bf16.msra.mxu1 %v1504_v27  ;;  %v1540_v55 = vld [vmem:[#allocation5 + $0x160] ss:$16 sps:$4 sm:$0xff]   ;;  %v1555_v58 = vld [vmem:[#allocation5 + $0x1ec] ss:$16 sps:$4 sm:$0xff]   ;;  %v1749_v60 = vld [vmem:[#allocation2 + $0x38] ss:$12 sps:$4 sm:$0xff]  }
  0x31   :  { %623 = vmatprep.subr.bf16.mxu0 %v1495_v21  ;;  %761 = vmatprep.subr.bf16.mxu1 %v1513_v28  ;;  %v1546_v59 = vld [vmem:[#allocation5 + $0x140] ss:$16 sps:$4 sm:$0xff]   ;;  %v1550_v61 = vld [vmem:[#allocation5 + $0x124] ss:$16 sps:$4 sm:$0xff]   ;;  %v1553_v62 = vld [vmem:[#allocation5 + $0x1e8] ss:$16 sps:$4 sm:$0xff]  }
  0x32   :  { %728 = vmatprep.mubr.bf16.mxu1 %v1680_v0  ;;  %v1561_v63 = vld [vmem:[#allocation5 + $0x1cc] ss:$16 sps:$4 sm:$0xff]   ;;  %v1552_v1 = vld [vmem:[#allocation5 + $0x120] ss:$16 sps:$4 sm:$0xff]   ;;  %v1556_v2 = vld [vmem:[#allocation5 + $0x104] ss:$16 sps:$4 sm:$0xff]  }
  0x33   :  { %v1559_v3 = vld [vmem:[#allocation5 + $0x1c8] ss:$16 sps:$4 sm:$0xff]   ;;  %v1568_v4 = vld [vmem:[#allocation5 + $0x1ac] ss:$16 sps:$4 sm:$0xff]   ;;  %v1558_v7 = vld [vmem:[#allocation5 + $0x100] ss:$16 sps:$4 sm:$0xff]  }
  0x34   :  { %624 = vmatpush1.bf16.msra.mxu0 %v1497_v24  ;;  %762 = vmatpush1.bf16.msra.mxu1 %v1511_v31  ;;  %v1591_v5 = vld [vmem:[#allocation5 + $0x24c] ss:$16 sps:$4 sm:$0x7f]   ;;  %v1566_v9 = vld [vmem:[#allocation5 + $0x1a8] ss:$16 sps:$4 sm:$0xff]  }
  0x35   :  { %625 = vmatprep.subr.bf16.mxu0 %v1501_v26  ;;  %763 = vmatprep.subr.bf16.mxu1 %v1519_v32  ;;  %v1754_v6 = vld [vmem:[#allocation2 + $0x50] ss:$12 sps:$4 sm:$0xff]   ;;  %v1589_v10 = vld [vmem:[#allocation5 + $0x248] ss:$16 sps:$4 sm:$0x7f]   ;;  %v611_v13 = vand.u32 %v1591_v5, %v1735_v8 }
  0x36   :  { %v1562_v11 = vld [vmem:[#allocation2] ss:$12 sps:$4 sm:$0xff]   ;;  %v1569_v14 = vld [vmem:[#allocation5 + $0x188] ss:$16 sps:$4 sm:$0xff]   ;;  %v608_v17 = vand.u32 %v1589_v10, %v1735_v8 }
  0x37   :  { %1442 = vmatmul.mubr.msk.bf16.gmra.mxu1 %vm584_vm2, %v1744_v50  ;;  %v1571_v12 = vld [vmem:[#allocation5 + $0x18c] ss:$16 sps:$4 sm:$0xff]   ;;  %v1576_v19 = vld [vmem:[#allocation5 + $0x168] ss:$16 sps:$4 sm:$0xff]   ;;  %v1582_v26 = vld [vmem:[#allocation2 + $0x34] ss:$12 sps:$4 sm:$0xff]  }
  0x38   :  { %626 = vmatpush1.bf16.msra.mxu0 %v1503_v29  ;;  %764 = vmatpush1.bf16.msra.mxu1 %v1517_v35  ;;  %v1572_v15 = vld [vmem:[#allocation2 + $0x1c] ss:$12 sps:$4 sm:$0xff]   ;;  %v1574_v23 = vld [vmem:[#allocation2 + $0x18] ss:$12 sps:$4 sm:$0xff]  }
  0x39   :  { %627 = vmatprep.subr.bf16.mxu0 %v1508_v30  ;;  %765 = vmatprep.subr.bf16.mxu1 %v1525_v36  ;;  %v1578_v16 = vld [vmem:[#allocation5 + $0x16c] ss:$16 sps:$4 sm:$0xff]   ;;  %v1598_v21 = vld [vmem:[#allocation5 + $0x228] ss:$16 sps:$4 sm:$0xff]  }
  0x3a   :  { %738 = vmatprep.mubr.bf16.mxu1 %v1680_v0  ;;  %v1600_v18 = vld [vmem:[#allocation5 + $0x22c] ss:$16 sps:$4 sm:$0xff]   ;;  %v1579_v24 = vld [vmem:[#allocation5 + $0x148] ss:$16 sps:$4 sm:$0xff]  }
  0x3b   :  { %v1581_v20 = vld [vmem:[#allocation5 + $0x14c] ss:$16 sps:$4 sm:$0xff]   ;;  %v1601_v28 = vld [vmem:[#allocation5 + $0x208] ss:$16 sps:$4 sm:$0xff]  }
  0x3c   :  { %628 = vmatpush1.bf16.msra.mxu0 %v1510_v33  ;;  %766 = vmatpush1.bf16.msra.mxu1 %v1523_v39  ;;  %v1603_v22 = vld [vmem:[#allocation5 + $0x20c] ss:$16 sps:$4 sm:$0xff]   ;;  %v1586_v8 = vld [vmem:[#allocation5 + $0x128] ss:$16 sps:$4 sm:$0xff]  }
  0x3d   :  { %629 = vmatprep.subr.bf16.mxu0 %v1514_v34  ;;  %767 = vmatprep.subr.bf16.mxu1 %v1531_v40  ;;  %v1588_v27 = vld [vmem:[#allocation5 + $0x12c] ss:$16 sps:$4 sm:$0xff]   ;;  %v1592_v31 = vld [vmem:[#allocation5 + $0x108] ss:$16 sps:$4 sm:$0xff]   ;;  %v932_v34 = vld [vmem:[%s1943_s4 + $0x10] sm:$0xff] }
  0x3e   :  { %v1594_v29 = vld [vmem:[#allocation5 + $0x10c] ss:$16 sps:$4 sm:$0xff]   ;;  %v1597_v33 = vld [vmem:[#allocation2 + $0x48] ss:$12 sps:$4 sm:$0xff]   ;;  %946 = vperm.xlu0 %1472, %v932_v34  }
  0x3f   :  { %1443 = vmatmul.mubr.msk.bf16.gmra.mxu1 %vm584_vm2, %v1749_v60  ;;  %v1584_v30 = vld [vmem:[#allocation2 + $0x30] ss:$12 sps:$4 sm:$0xff]   ;;  %v1595_v32 = vld [vmem:[#allocation2 + $0x4c] ss:$12 sps:$4 sm:$0xff]  }
  0x40   :  { %630 = vmatpush2.bf16.msra.mxu0 %v1516_v37  ;;  %768 = vmatpush1.bf16.msra.mxu1 %v1529_v43  ;;  %v931_v35 = vld [vmem:[%s1943_s4 + $0x8] sm:$0xff]  ;;  %v933_v36 = vld [vmem:[%s1943_s4 + $0x18] sm:$0xff]  ;;  %v954_v37 = vld [vmem:[%s1945_s6] sm:$0xff] }
  0x41   :  { %631 = vmatprep.subr.bf16.mxu0 %v1520_v38  ;;  %769 = vmatprep.subr.bf16.mxu1 %v1537_v44 }
  0x42   :  { %748 = vmatprep.mubr.bf16.mxu1 %v1680_v0  ;;  %951 = vperm.xlu0 %1472, %v933_v36  }
  0x44   :  { %632 = vmatpush2.bf16.msra.mxu0 %v1522_v41  ;;  %770 = vmatpush1.bf16.msra.mxu1 %v1535_v47 }
  0x45   :  { %633 = vmatprep.subr.bf16.mxu0 %v1526_v42  ;;  %771 = vmatprep.subr.bf16.mxu1 %v1543_v48 }
  0x46   :  { %957 = vperm.xlu0 %1472, %v954_v37  }
  0x47   :  { %1444 = vmatmul.mubr.msk.bf16.gmra.mxu1 %vm584_vm2, %v1754_v6 }
  0x48   :  { %634 = vmatpush2.bf16.msra.mxu0 %v1528_v45  ;;  %772 = vmatpush1.bf16.msra.mxu1 %v1541_v52 }
  0x49   :  { %635 = vmatprep.subr.bf16.mxu0 %v1532_v46  ;;  %773 = vmatprep.subr.bf16.mxu1 %v1549_v54 }
  0x4a   :  { %791 = vmatprep.mubr.bf16.mxu1 %v1564_v49 }
  0x4c   :  { %636 = vmatpush2.bf16.msra.mxu0 %v1534_v51  ;;  %774 = vmatpush1.bf16.msra.mxu1 %v1547_v56 }
  0x4d   :  { %637 = vmatprep.subr.bf16.mxu0 %v1538_v53  ;;  %775 = vmatprep.subr.bf16.mxu1 %v1555_v58 }
  0x50   :  { %638 = vmatpush2.bf16.msra.mxu0 %v1540_v55  ;;  %776 = vmatpush2.bf16.msra.mxu1 %v1553_v62 }
  0x51   :  { %639 = vmatprep.subr.bf16.mxu0 %v1544_v57  ;;  %777 = vmatprep.subr.bf16.mxu1 %v1561_v63 }
  0x54   :  { %640 = vmatpush2.bf16.msra.mxu0 %v1546_v59  ;;  %778 = vmatpush2.bf16.msra.mxu1 %v1559_v3 }
  0x55   :  { %641 = vmatprep.subr.bf16.mxu0 %v1550_v61  ;;  %779 = vmatprep.subr.bf16.mxu1 %v1568_v4 }
  0x58   :  { %642 = vmatpush2.bf16.msra.mxu0 %v1552_v1  ;;  %780 = vmatpush2.bf16.msra.mxu1 %v1566_v9 }
  0x59   :  { %643 = vmatprep.subr.bf16.mxu0 %v1556_v2  ;;  %781 = vmatprep.subr.bf16.mxu1 %v1571_v12 }
  0x5c   :  { %644 = vmatpush2.bf16.msra.mxu0 %v1558_v7  ;;  %782 = vmatpush2.bf16.msra.mxu1 %v1569_v14 }
  0x5d   :  { %842 = vmatprep.subr.bf16.mxu0 %v611_v13  ;;  %783 = vmatprep.subr.bf16.mxu1 %v1578_v16 }
  0x5f   :  { %646 = vmatmul.mubr.bf16.vlgmr.msra.gmra.mxu0 %v1562_v11 }
  0x60   :  { %655 = vmatprep.mubr.bf16.mxu0 %v1572_v15  ;;  %843 = vmatpush1.bf16.msra.mxu0 %v608_v17 }
  0x61   :  { %844 = vmatprep.subr.bf16.mxu0 %v1600_v18  ;;  %784 = vmatpush2.bf16.msra.mxu1 %v1576_v19 }
  0x62   :  { %785 = vmatprep.subr.bf16.mxu1 %v1581_v20 }
  0x64   :  { %845 = vmatpush1.bf16.msra.mxu0 %v1598_v21 }
  0x65   :  { %846 = vmatprep.subr.bf16.mxu0 %v1603_v22  ;;  %786 = vmatpush2.bf16.msra.mxu1 %v1579_v24 }
  0x66   :  { %787 = vmatprep.subr.bf16.mxu1 %v1588_v27 }
  0x67   :  { %656 = vmatmul.mubr.bf16.gmra.mxu0 %v1574_v23 }
  0x68   :  { %665 = vmatprep.mubr.bf16.mxu0 %v1582_v26  ;;  %847 = vmatpush1.bf16.msra.mxu0 %v1601_v28 }
  0x69   :  { %788 = vmatpush2.bf16.msra.mxu1 %v1586_v8 }
  0x6a   :  { %789 = vmatprep.subr.bf16.mxu1 %v1594_v29 }
  0x6d   :  { %790 = vmatpush2.bf16.msra.mxu1 %v1592_v31 }
  0x6f   :  { %666 = vmatmul.mubr.bf16.gmra.mxu0 %v1584_v30 }
  0x70   :  { %675 = vmatprep.mubr.bf16.mxu0 %v1595_v32  ;;  %792 = vmatmul.mubr.bf16.vlgmr.msra.gmra.mxu1 %v1562_v11 }
  0x71   :  { %801 = vmatprep.mubr.bf16.mxu1 %v1572_v15 }
  0x77   :  { %676 = vmatmul.mubr.bf16.gmra.mxu0 %v1597_v33 }
  0x78   :  { %864 = vmatprep.mubr.bf16.mxu0 %v1680_v0  ;;  %802 = vmatmul.mubr.bf16.gmra.mxu1 %v1574_v23 }
  0x79   :  { %811 = vmatprep.mubr.bf16.mxu1 %v1582_v26 }
  0x7f   :  { %1445 = vmatmul.mubr.msk.bf16.vlgmr.msra.gmra.mxu0 %vm584_vm2, %v1739_v25  ;;  %v930_v25 = vld [vmem:[%s1943_s4] sm:$0xff] }
  0x80   :  { %874 = vmatprep.mubr.bf16.mxu0 %v1680_v0  ;;  %812 = vmatmul.mubr.bf16.gmra.mxu1 %v1584_v30 }
  0x81   :  { %821 = vmatprep.mubr.bf16.mxu1 %v1595_v32  ;;  %936 = vperm.xlu1 %1473, %v930_v25  }
  0x85   :  { %941 = vperm.xlu1 %1473, %v931_v35  }
  0x87   :  { %1446 = vmatmul.mubr.msk.bf16.gmra.mxu0 %vm584_vm2, %v1744_v50 }
  0x88   :  { %884 = vmatprep.mubr.bf16.mxu0 %v1680_v0  ;;  %822 = vmatmul.mubr.bf16.gmra.mxu1 %v1597_v33 }
  0x89   :  { %1009 = vmatprep.mubr.bf16.mxu1 %v1680_v0 }
  0x8f   :  { %1447 = vmatmul.mubr.msk.bf16.gmra.mxu0 %vm584_vm2, %v1749_v60 }
  0x90   :  { %894 = vmatprep.mubr.bf16.mxu0 %v1680_v0 }
  0x97   :  { %1448 = vmatmul.mubr.msk.bf16.gmra.mxu0 %vm584_vm2, %v1754_v6 }
  0x98   :  { %1154 = vmatprep.mubr.bf16.mxu0 %v1680_v0 }
  0xef   :  { %v1789_v38 = vpop.f32.mrf.mxu1 }
  0xf1   :  { %v1791_v39 = vpop.f32.mrf.mxu1 }
  0xf3   :  { %v1793_v40 = vpop.f32.mrf.mxu1 }
  0xf5   :  { %v1795_v41 = vpop.f32.mrf.mxu1 }
  0xf7   :  { %v1797_v42 = vpop.f32.mrf.mxu1 }
  0xf9   :  { %v732_v43 = vpop.f32.mrf.mxu1 }
  0xfb   :  { %v734_v44 = vpop.f32.mrf.mxu1 }
  0xfd   :  { %v736_v45 = vpop.f32.mrf.mxu1 }
  0xff   :  { %v1799_v46 = vpop.f32.mrf.mxu1 }
 0x101   :  { %v1801_v47 = vpop.f32.mrf.mxu1 }
 0x103   :  { %v1803_v48 = vpop.f32.mrf.mxu1 }
 0x105   :  { %v1807_v50 = vpop.f32.mrf.mxu1 }
 0x107   :  { %v1809_v53 = vpop.f32.mrf.mxu1 }
 0x109   :  { %v1811_v56 = vpop.f32.mrf.mxu1 }
 0x10b   :  { %v1813_v59 = vpop.f32.mrf.mxu1 }
 0x10d   :  { %v756_v62 = vpop.f32.mrf.mxu1 }
 0x11f   :  { %v1805_v49 = vpop.f32.mrf.mxu0 }
 0x121   :  { %v649_v51 = vpop.f32.mrf.mxu0 }
 0x123   :  { %v651_v52 = vpop.f32.mrf.mxu0 }
 0x125   :  { %v653_v54 = vpop.f32.mrf.mxu0 }
 0x127   :  { %v657_v55 = vpop.f32.mrf.mxu0 }
 0x129   :  { %v659_v57 = vpop.f32.mrf.mxu0 }
 0x12a   :  { %v733_v35 = vadd.f32 %v732_v43, %v659_v57  ;;  %v725_v43 = vadd.f32 %v1793_v40, %v651_v52  ;;  %v1843_v40 = vld [vmem:[%s1942_s3 + $0x8] sm:$0xff]  }
 0x12b   :  { %v661_v58 = vpop.f32.mrf.mxu0 }
 0x12c   :  { %v735_v36 = vadd.f32 %v734_v44, %v661_v58 }
 0x12d   :  { %v663_v60 = vpop.f32.mrf.mxu0 }
 0x12e   :  { %v737_v33 = vadd.f32 %v736_v45, %v663_v60  ;;  %v723_v45 = vadd.f32 %v1791_v39, %v649_v51  ;;  %v1606_v51 = vld [vmem:[%s1941_s2] sm:$0xff]  }
 0x12f   :  { %v1815_v61 = vpop.f32.mrf.mxu0 }
 0x130   :  { %v793_v2 = vpop.f32.mrf.mxu1 }
 0x131   :  { %v1817_v63 = vpop.f32.mrf.mxu0 }
 0x132   :  { %v795_v4 = vpop.f32.mrf.mxu1 }
 0x133   :  { %v1819_v1 = vpop.f32.mrf.mxu0 }
 0x134   :  { %v797_v7 = vpop.f32.mrf.mxu1 }
 0x135   :  { %v1821_v3 = vpop.f32.mrf.mxu0 }
 0x136   :  { %v799_v11 = vpop.f32.mrf.mxu1 }
 0x137   :  { %v1823_v5 = vpop.f32.mrf.mxu0 }
 0x138   :  { %v803_v13 = vpop.f32.mrf.mxu1  ;;  %v751_v52 = vadd.f32 %v1809_v53, %v1823_v5  ;;  %v1607_v53 = vld [vmem:[%s1941_s2 + $0x8] sm:$0xff]  }
 0x139   :  { %v679_v6 = vpop.f32.mrf.mxu0 }
 0x13a   :  { %v805_v16 = vpop.f32.mrf.mxu1 }
 0x13b   :  { %v681_v9 = vpop.f32.mrf.mxu0 }
 0x13c   :  { %v807_v19 = vpop.f32.mrf.mxu1 }
 0x13d   :  { %v683_v10 = vpop.f32.mrf.mxu0 }
 0x13e   :  { %v809_v22 = vpop.f32.mrf.mxu1  ;;  %v757_v58 = vadd.f32 %v756_v62, %v683_v10 }
 0x13f   :  { %v866_v12 = vpop.f32.mrf.mxu0 }
 0x140   :  { %v867_v34 = vadd.f32 %v866_v12, %v793_v2 }
 0x141   :  { %v868_v14 = vpop.f32.mrf.mxu0 }
 0x142   :  { %v869_v29 = vadd.f32 %v868_v14, %v795_v4  ;;  %v731_v4 = vadd.f32 %v1797_v42, %v657_v55  ;;  %v753_v42 = vadd.f32 %v1811_v56, %v679_v6  ;;  %v743_v55 = vadd.f32 %v1801_v47, %v1817_v63 }
 0x143   :  { %v870_v15 = vpop.f32.mrf.mxu0  ;;  %v745_v56 = vadd.f32 %v1803_v48, %v1819_v1 }
 0x144   :  { %v871_v31 = vadd.f32 %v870_v15, %v797_v7  ;;  %v909_v57 = vpack.c.bf16 %v735_v36, %v731_v4  ;;  %v918_v39 = vpack.c.bf16 %v757_v58, %v753_v42 }
 0x145   :  { %v872_v17 = vpop.f32.mrf.mxu0 }
 0x146   :  { %v873_v26 = vadd.f32 %v872_v17, %v799_v11  ;;  %v907_v37 = vpack.c.bf16 %v871_v31, %v867_v34  ;;  %v1829_v11 = vld [vmem:[%s1942_s3] sm:$0xff]  }
 0x147   :  { %v876_v18 = vpop.f32.mrf.mxu0 }
 0x148   :  { %v877_v8 = vadd.f32 %v876_v18, %v803_v13  ;;  %v908_v25 = vpack.c.bf16 %v873_v26, %v869_v29 }
 0x149   :  { %v878_v20 = vpop.f32.mrf.mxu0 }
 0x14a   :  { %v879_v27 = vadd.f32 %v878_v20, %v805_v16 }
 0x14b   :  { %v880_v21 = vpop.f32.mrf.mxu0 }
 0x14c   :  { %v881_v23 = vadd.f32 %v880_v21, %v807_v19  ;;  %v727_v19 = vadd.f32 %v1795_v41, %v653_v54  ;;  %v910_v21 = vpack.c.bf16 %v737_v33, %v733_v35  ;;  %v721_v41 = vadd.f32 %v1789_v38, %v1805_v49 }
 0x14d   :  { %v882_v24 = vpop.f32.mrf.mxu0  ;;  %v755_v38 = vadd.f32 %v1813_v59, %v681_v9  ;;  %v747_v49 = vadd.f32 %v1807_v50, %v1821_v3  ;;  %v741_v50 = vadd.f32 %v1799_v46, %v1815_v61  ;;  %v1872_v46 = vpop.f32.mrf.mxu1 }
 0x14e   :  { %v883_v28 = vadd.f32 %v882_v24, %v809_v22  ;;  %v911_v32 = vpack.c.bf16 %v881_v23, %v877_v8  ;;  %v906_v44 = vpack.c.bf16 %v727_v19, %v723_v45  ;;  %v905_v54 = vpack.c.bf16 %v725_v43, %v721_v41 }
 0x14f   :  { %v917_v60 = vpack.c.bf16 %v755_v38, %v751_v52  ;;  %v914_v62 = vpack.c.bf16 %v747_v49, %v743_v55  ;;  %v913_v59 = vpack.c.bf16 %v745_v56, %v741_v50  ;;  %v1874_v47 = vpop.f32.mrf.mxu1  ;;  %v1884_v10 = vpop.f32.mrf.mxu0 }
 0x150   :  { %v912_v30 = vpack.c.bf16 %v883_v28, %v879_v27  ;;  %v1886_v27 = vpop.permute.xlu1 %936  ;;  %v1888_v28 = vpop.permute.xlu0 %946 }
 0x151   :  { %v1876_v48 = vpop.f32.mrf.mxu1  ;;  %v888_v14 = vpop.f32.mrf.mxu0 }
 0x152   :  { %989 = vmatprep.subr.bf16.mxu1 %v912_v30 }
 0x153   :  { %990 = vmatpush1.bf16.msra.mxu1 %v911_v32  ;;  %v1878_v61 = vpop.f32.mrf.mxu1  ;;  %v890_v17 = vpop.f32.mrf.mxu0 }
 0x154   :  { %991 = vmatprep.subr.bf16.mxu1 %v908_v25  ;;  %v1890_v35 = vpop.permute.xlu1 %941  ;;  %v1892_v19 = vpop.permute.xlu0 %951 }
 0x155   :  { %v1880_v63 = vpop.f32.mrf.mxu1  ;;  %v892_v22 = vpop.f32.mrf.mxu0 }
 0x157   :  { %992 = vmatpush1.bf16.msra.mxu1 %v907_v37  ;;  %v825_v1 = vpop.f32.mrf.mxu1  ;;  %v896_v26 = vpop.f32.mrf.mxu0 }
 0x158   :  { %1058 = vmatprep.subr.bf16.mxu1 %v910_v21 }
 0x159   :  { %v1882_v2 = vpop.f32.mrf.mxu1  ;;  %v898_v32 = vpop.f32.mrf.mxu0 }
 0x15a   :  { %1451 = vmatmul.mubr.msk.bf16.vlgmr.msra.gmra.mxu1 %vm970_vm3, %v1829_v11 }
 0x15b   :  { %1059 = vmatpush1.bf16.msra.mxu1 %v909_v57  ;;  %1019 = vmatprep.mubr.bf16.mxu1 %v1680_v0  ;;  %v829_v3 = vpop.f32.mrf.mxu1 }
 0x15c   :  { %1060 = vmatprep.subr.bf16.mxu1 %v906_v44  ;;  %v900_v44 = vpop.f32.mrf.mxu0 }
 0x15e   :  { %v902_v55 = vpop.f32.mrf.mxu0 }
 0x15f   :  { %1061 = vmatpush1.bf16.msra.mxu1 %v905_v54 }
 0x160   :  { %1230 = vmatprep.subr.bf16.mxu1 %v918_v39 }
 0x162   :  { %1452 = vmatmul.mubr.msk.bf16.gmra.mxu1 %vm970_vm3, %v1843_v40 }
 0x163   :  { %1078 = vmatprep.mubr.bf16.mxu1 %v1680_v0 }
 0x16a   :  { %1455 = vmatmul.mubr.msk.bf16.vlgmr.msra.gmra.mxu1 %vm970_vm3, %v1606_v51 }
 0x16b   :  { %1231 = vmatpush1.bf16.msra.mxu1 %v917_v60  ;;  %1088 = vmatprep.mubr.bf16.mxu1 %v1680_v0 }
 0x16c   :  { %1232 = vmatprep.subr.bf16.mxu1 %v914_v62 }
 0x16f   :  { %1233 = vmatpush1.bf16.msra.mxu1 %v913_v59 }
 0x172   :  { %1456 = vmatmul.mubr.msk.bf16.gmra.mxu1 %vm970_vm3, %v1607_v53 }
 0x173   :  { %1250 = vmatprep.mubr.bf16.mxu1 %v1680_v0 }
 0x17a   :  { %1460 = vmatmul.mubr.msk.bf16.vlgmr.msra.gmra.mxu1 %vm970_vm3, %v1606_v51 }
 0x17b   :  { %1260 = vmatprep.mubr.bf16.mxu1 %v1680_v0 }
 0x182   :  { %1461 = vmatmul.mubr.msk.bf16.gmra.mxu1 %vm970_vm3, %v1607_v53 }
 0x21a   :  { %v1011_v5 = vpop.f32.mrf.mxu1 }
 0x21c   :  { %v1013_v6 = vpop.f32.mrf.mxu1 }
 0x21e   :  { %v1015_v7 = vpop.f32.mrf.mxu1 }
 0x220   :  { %v1017_v9 = vpop.f32.mrf.mxu1 }
 0x222   :  { %v1021_v12 = vpop.f32.mrf.mxu1 }
 0x224   :  { %v1023_v13 = vpop.f32.mrf.mxu1 }
 0x226   :  { %v1025_v15 = vpop.f32.mrf.mxu1 }
 0x228   :  { %v1027_v16 = vpop.f32.mrf.mxu1 }
 0x22a   :  { %v1080_v18 = vpop.f32.mrf.mxu1 }
 0x22b   :  { %v1081_v58 = vadd.f32 %v1080_v18, %v1011_v5  ;;  %v899_v5 = vadd.f32 %v898_v32, %v825_v1  ;;  %v893_v18 = vadd.f32 %v892_v22, %v1878_v61  ;;  %v1909_v1 = vld [vmem:[%s1944_s5] sm:$0xf]  ;;  %v958_v61 = vpop.permute.xlu0 %957  ;;  %s1682_s5 = smov [#allocation7]  }
 0x22c   :  { %v1082_v20 = vpop.f32.mrf.mxu1  ;;  %s1340_s29 = sshll.u32 %s1682_s5, 4  ;;  %s1341_s29 = int_to_ptr.vmem [resolvable:$true] %s1340_s29 }
 0x22d   :  { %v1083_v34 = vadd.f32 %v1082_v20, %v1013_v6  ;;  %v1099_v56 = vadd.f32 %v1081_v58, %v1886_v27  ;;  %v903_v6 = vadd.f32 %v902_v55, %v829_v3  ;;  %v887_v3 = vadd.f32 %v1884_v10, %v1872_v46  ;;  %s1648_s30 = scalar_lea.vmem %s1341_s29, 512  ;;  %p1653_p11 = scmp.lt.s32.totalorder %s1341_s29, %s1341_s29 }
 0x22e   :  { %v1084_v23 = vpop.f32.mrf.mxu1  ;;  %p1649_p10 = scmp.ne.s32.totalorder %s1341_s29, %s1648_s30  ;;  %p1654_p12 = scmp.lt.s32.totalorder %s1648_s30, %s1648_s30 }
 0x22f   :  { %v1085_v37 = vadd.f32 %v1084_v23, %v1015_v7  ;;  %v1100_v42 = vadd.f32 %v1083_v34, %v1886_v27  ;;  %v920_v20 = vpack.c.bf16 %v903_v6, %v899_v5 }
 0x230   :  { %v1086_v24 = vpop.f32.mrf.mxu1  ;;  %p1655_p13 = por %p1654_p12, %p1653_p11 }
 0x231   :  { %v1087_v30 = vadd.f32 %v1086_v24, %v1017_v9  ;;  %v1101_v39 = vadd.f32 %v1085_v37, %v1890_v35  ;;  %v1108_v62 = vmax.f32 %v1100_v42, 0.0  ;;  %v1107_v9 = vmax.f32 %v1099_v56, 0.0 }
 0x232   :  { %v1090_v8 = vpop.f32.mrf.mxu1  ;;  %p1656_p0 = pnand %p1655_p13, %p1649_p10 }
 0x233   :  { %v1091_v33 = vadd.f32 %v1090_v8, %v1021_v12  ;;  %v1102_v4 = vadd.f32 %v1087_v30, %v1890_v35  ;;  %v1109_v59 = vmax.f32 %v1101_v39, 0.0  ;;  %v897_v12 = vadd.f32 %v896_v26, %v1880_v63 }
 0x234   :  { %v1092_v29 = vpop.f32.mrf.mxu1  ;;  %v891_v63 = vadd.f32 %v890_v17, %v1876_v48 }
 0x235   :  { %v1093_v31 = vadd.f32 %v1092_v29, %v1023_v13  ;;  %v1103_v41 = vadd.f32 %v1091_v33, %v1888_v28  ;;  %v1110_v49 = vmax.f32 %v1102_v4, 0.0  ;;  %v901_v13 = vadd.f32 %v900_v44, %v1882_v2 }
 0x236   :  { %v1094_v25 = vpop.f32.mrf.mxu1 }
 0x237   :  { %v1095_v36 = vadd.f32 %v1094_v25, %v1025_v15  ;;  %v1104_v45 = vadd.f32 %v1093_v31, %v1888_v28  ;;  %v1111_v60 = vmax.f32 %v1103_v41, 0.0  ;;  %v1116_v7 = vpack.c.bf16 %v1110_v49, %v1108_v62 }
 0x238   :  { %v1096_v21 = vpop.f32.mrf.mxu1  ;;  %v1115_v15 = vpack.c.bf16 %v1109_v59, %v1107_v9  ;;  %v919_v23 = vpack.c.bf16 %v901_v13, %v897_v12 }
 0x239   :  { %v1105_v43 = vadd.f32 %v1095_v36, %v1892_v19  ;;  %v1097_v57 = vadd.f32 %v1096_v21, %v1027_v16  ;;  %v1112_v51 = vmax.f32 %v1104_v45, 0.0  ;;  %v889_v16 = vadd.f32 %v888_v14, %v1874_v47 }
 0x23a   :  { %v915_v47 = vpack.c.bf16 %v891_v63, %v887_v3  ;;  %v1252_v46 = vpop.f32.mrf.mxu1 }
 0x23b   :  { %v1106_v54 = vadd.f32 %v1097_v57, %v1892_v19  ;;  %v1113_v38 = vmax.f32 %v1105_v43, 0.0  ;;  %v916_v2 = vpack.c.bf16 %v893_v18, %v889_v16 }
 0x23c   :  { %v1254_v48 = vpop.f32.mrf.mxu1 }
 0x23d   :  { %v1114_v52 = vmax.f32 %v1106_v54, 0.0  ;;  %v1117_v53 = vpack.c.bf16 %v1113_v38, %v1111_v60 }
 0x23e   :  { %v1256_v22 = vpop.f32.mrf.mxu1 }
 0x23f   :  { %v1118_v50 = vpack.c.bf16 %v1114_v52, %v1112_v51 }
 0x241   :  { %1134 = vmatprep.subr.bf16.mxu0 %v1118_v50 }
 0x242   :  { %1135 = vmatpush1.bf16.msra.mxu0 %v1117_v53 }
 0x243   :  { %1136 = vmatprep.subr.bf16.mxu0 %v1116_v7 }
 0x246   :  { %1137 = vmatpush1.bf16.msra.mxu0 %v1115_v15 }
 0x247   :  { %1177 = vmatprep.subr.bf16.mxu0 %v920_v20 }
 0x249   :  { %1457 = vmatmul.mubr.msk.bf16.vlgmr.msra.gmra.mxu0 %vm970_vm3, %v1909_v1 }
 0x24a   :  { %1178 = vmatpush1.bf16.msra.mxu0 %v919_v23  ;;  %1197 = vmatprep.mubr.bf16.mxu0 %v1680_v0 }
 0x24b   :  { %1179 = vmatprep.subr.bf16.mxu0 %v916_v2 }
 0x24e   :  { %1180 = vmatpush1.bf16.msra.mxu0 %v915_v47 }
 0x251   :  { %1458 = vmatmul.mubr.msk.bf16.vlgmr.msra.gmra.mxu0 %vm970_vm3, %v1829_v11  ;;  %v1258_v11 = vpop.f32.mrf.mxu1 }
 0x252   :  { %1207 = vmatprep.mubr.bf16.mxu0 %v1680_v0 }
 0x253   :  { %v1262_v31 = vpop.f32.mrf.mxu1 }
 0x255   :  { %v1264_v33 = vpop.f32.mrf.mxu1 }
 0x257   :  { %v1266_v34 = vpop.f32.mrf.mxu1 }
 0x259   :  { %1459 = vmatmul.mubr.msk.bf16.gmra.mxu0 %vm970_vm3, %v1843_v40  ;;  %v1268_v58 = vpop.f32.mrf.mxu1 }
 0x25a   :  { %1323 = vmatprep.mubr.bf16.mxu0 %v1680_v0 }
 0x309   :  { %v1156_v10 = vpop.f32.mrf.mxu0 }
 0x30a   :  { %v1157_v14 = vadd.f32 %v1156_v10, %v958_v61 }
 0x30b   :  { %v1158_v17 = vpop.f32.mrf.mxu0 }
 0x30c   :  { %1163 = vst [vmem:[#allocation7] sm:$0xff] %v1157_v14  ;;  %v1159_v24 = vadd.f32 %v1158_v17, %v958_v61 }
 0x30d   :  { %v1160_v26 = vpop.f32.mrf.mxu0 }
 0x30e   :  { %1164 = vst [vmem:[#allocation7 + $0x8] sm:$0xff] %v1159_v24 }
 0x30f   :  { %v1161_v8 = vpop.f32.mrf.mxu0 }
 0x311   :  { %v1199_v29 = vpop.f32.mrf.mxu0 }
 0x312   :  { %v1253_v38 = vadd.f32 %v1252_v46, %v1199_v29 }
 0x313   :  { %v1201_v30 = vpop.f32.mrf.mxu0 }
 0x314   :  { %v1255_v45 = vadd.f32 %v1254_v48, %v1201_v30  ;;  %v1271_v59 = vadd.f32 %v1253_v38, %v1886_v27 }
 0x315   :  { %v1203_v32 = vpop.f32.mrf.mxu0 }
 0x316   :  { %v1257_v57 = vadd.f32 %v1256_v22, %v1203_v32  ;;  %v1272_v51 = vadd.f32 %v1255_v45, %v1886_v27 }
 0x317   :  { %v1205_v40 = vpop.f32.mrf.mxu0 }
 0x318   :  { %v1259_v36 = vadd.f32 %v1258_v11, %v1205_v40  ;;  %v1273_v55 = vadd.f32 %v1257_v57, %v1890_v35  ;;  %v1280_v5 = vmax.f32 %v1272_v51, 0.0 }
 0x319   :  { %v1209_v0 = vpop.f32.mrf.mxu0 }
 0x31a   :  { %v1263_v21 = vadd.f32 %v1262_v31, %v1209_v0  ;;  %v1274_v41 = vadd.f32 %v1259_v36, %v1890_v35  ;;  %v1281_v7 = vmax.f32 %v1273_v55, 0.0 }
 0x31b   :  { %v1211_v25 = vpop.f32.mrf.mxu0 }
 0x31c   :  { %v1265_v37 = vadd.f32 %v1264_v33, %v1211_v25  ;;  %v1275_v49 = vadd.f32 %v1263_v21, %v1888_v28  ;;  %v1282_v60 = vmax.f32 %v1274_v41, 0.0 }
 0x31d   :  { %v1213_v4 = vpop.f32.mrf.mxu0 }
 0x31e   :  { %v1267_v43 = vadd.f32 %v1266_v34, %v1213_v4  ;;  %v1276_v42 = vadd.f32 %v1265_v37, %v1888_v28  ;;  %v1283_v53 = vmax.f32 %v1275_v49, 0.0  ;;  %v1288_v12 = vpack.c.bf16 %v1282_v60, %v1280_v5 }
 0x31f   :  { %v1215_v44 = vpop.f32.mrf.mxu0  ;;  %v1279_v28 = vmax.f32 %v1271_v59, 0.0 }
 0x320   :  { %v1277_v54 = vadd.f32 %v1267_v43, %v1892_v19  ;;  %v1269_v39 = vadd.f32 %v1268_v58, %v1215_v44  ;;  %v1284_v62 = vmax.f32 %v1276_v42, 0.0 }
 0x321   :  { %v1287_v13 = vpack.c.bf16 %v1281_v7, %v1279_v28 }
 0x322   :  { %v1278_v52 = vadd.f32 %v1269_v39, %v1892_v19  ;;  %v1285_v56 = vmax.f32 %v1277_v54, 0.0 }
 0x324   :  { %v1286_v50 = vmax.f32 %v1278_v52, 0.0  ;;  %v1289_v9 = vpack.c.bf16 %v1285_v56, %v1283_v53 }
 0x326   :  { %v1290_v6 = vpack.c.bf16 %v1286_v50, %v1284_v62 }
 0x328   :  { %1303 = vmatprep.subr.bf16.mxu0 %v1290_v6 }
 0x329   :  { %1304 = vmatpush1.bf16.msra.mxu0 %v1289_v9 }
 0x32a   :  { %1305 = vmatprep.subr.bf16.mxu0 %v1288_v12 }
 0x32d   :  { %1306 = vmatpush1.bf16.msra.mxu0 %v1287_v13 }
 0x330   :  { %1462 = vmatmul.mubr.msk.bf16.vlgmr.msra.gmra.mxu0 %vm970_vm3, %v1909_v1 }
 0x3f0   :  { %v1325_v35 = vpop.f32.mrf.mxu0 }
 0x3f1   :  { %v1326_v19 = vadd.f32 %v1325_v35, %v958_v61 }
 0x3f2   :  { %v1327_v27 = vpop.f32.mrf.mxu0 }
 0x3f3   :  { %1333 = vst [vmem:[#allocation7 + $0x10] sm:$0xff] %v1326_v19  ;;  %v1328_v15 = vadd.f32 %v1327_v27, %v958_v61 }
 0x3f4   :  { %v1329_v16 = vpop.f32.mrf.mxu0 }
 0x3f5   :  { %1334 = vst [vmem:[#allocation7 + $0x18] sm:$0xff] %v1328_v15 }
 0x3f6   :  { %v1330_v18 = vpop.f32.mrf.mxu0 }
 0x3f7   :  { %1659 = shalt.err (!%p1656_p0)
}
 0x3f8   :  { %1346 = dma.vmem_to_hbm [thread:$0]  %s1341_s29, 512, %s1946_s7, [#allocation4], %s1678_s11, %s1678_s11, %s1679_s12  }
 0x3f9   :  { %1672 = dma.done.wait [#allocation4], 512  }
 0x3fa   :  { %1673 = vsyncadd [#allocation4], 4294966784 }
 0x3fb   :  { %1350 = vsyncpa [#allocation3], 1 }
 0x3fc   :  { %1351 = vsyncpa [#allocation6], 1 }
 0x3fd   :  { %1352 = vsyncpa [#allocation4], 1 }

</bundles_post_ra>
